<compile_context>
chip_gen: v5e
topology: v5e:2x2
jax: 0.10.0
libtpu: 0.0.40
codegen_flags: <defaults>
</compile_context>

<pallas_src>
import functools

import jax
import jax.numpy as jnp
from jax.experimental import pallas as pl
from jax.experimental.pallas import tpu as pltpu

_LANES = 128
_SUBLANES = 8
_TARGET_ROWS = 2048                     # rows of 128 lanes per grid step
_LN10_OVER_10 = 0.23025850929940457     # ln(10) / 10


def _euclid_rad_kernel(pred_ref, tgt_ref, out_ref, acc_ref, *,
                       inner, tile_r, valid_rows):
    """Accumulate |pred_euc - target_euc| over one (tile_r, 128) slab."""
    k = pl.program_id(2)

    @pl.when(k == 0)
    def _init():
        acc_ref[...] = jnp.zeros_like(acc_ref)

    # mag / phase are adjacent slabs along axis 1 of the fused block (free views).
    pm = pred_ref[0, 0].astype(jnp.float32)
    pp = pred_ref[0, 1].astype(jnp.float32)
    tm = tgt_ref[0, 0].astype(jnp.float32)
    tp = tgt_ref[0, 1].astype(jnp.float32)

    # Mask rows beyond the valid extent (partial edge block).  Zero the INPUTS
    # before exp/sin: zeroed samples give a = b = 1, dphi = 0 -> contribute 0,
    # and garbage edge data can never produce Inf/NaN.
    row_off = (pl.program_id(1) * inner + k) * tile_r
    rows = jax.lax.broadcasted_iota(jnp.int32, (tile_r, _LANES), 0)
    mask = rows < (valid_rows - row_off)
    zero = jnp.float32(0.0)
    pm = jnp.where(mask, pm, zero)
    pp = jnp.where(mask, pp, zero)
    tm = jnp.where(mask, tm, zero)
    tp = jnp.where(mask, tp, zero)

    c = jnp.float32(_LN10_OVER_10)
    a = jnp.exp(pm * c)                      # pred magnitude: dB -> linear
    b = jnp.exp(tm * c)                      # target magnitude: dB -> linear
    s = jnp.sin(0.5 * (pp - tp))
    # |a e^{i pa} - b e^{i pb}|^2 = (a-b)^2 + 4 a b sin^2((pa-pb)/2)  (stable)
    rad = (a - b) * (a - b) + 4.0 * (a * b) * (s * s)
    mag_diff = jnp.sqrt(jnp.maximum(rad, zero))

    # Fold (tile_r, 128) -> (8, 128): pure VALU vreg adds, no cross-lane work.
    acc_ref[...] += jnp.sum(mag_diff.reshape(-1, _SUBLANES, _LANES), axis=0)

    @pl.when(k == pl.num_programs(2) - 1)
    def _finalize():
        out_ref[0, 0] = acc_ref[...]


@jax.jit
def euclidean_radiation_loss(radiation_pred, radiation_target):
    """Mean |pred_euc - target_euc| for NCHW (B, 2*C, H, W) inputs."""
    B, C2, H, W = radiation_pred.shape
    sep = C2 // 2
    M = sep * H * W                      # complex samples per (batch, half)
    n_elems = B * M

    # Free view: the channel axis (2*sep) splits into (2, sep); mag is index 0,
    # phase is index 1 along the new axis.  No slicing, no dtype copies.
    pred = radiation_pred.reshape(B, 2, M)
    tgt = radiation_target.reshape(B, 2, M)

    # Lane alignment.  Common case (M % 128 == 0) is a zero-copy reshape; the
    # rare unaligned case pads the tail with zeros (zeros contribute exactly 0).
    M_lane = ((M + _LANES - 1) // _LANES) * _LANES
    if M_lane != M:
        pred = jnp.pad(pred, ((0, 0), (0, 0), (0, M_lane - M)))
        tgt = jnp.pad(tgt, ((0, 0), (0, 0), (0, M_lane - M)))
    R_rows = M_lane // _LANES

    itemsize = min(jnp.dtype(radiation_pred.dtype).itemsize,
                   jnp.dtype(radiation_target.dtype).itemsize)
    row_align = _SUBLANES * max(1, 4 // itemsize)   # 8 for f32, 16 for bf16/f16
    tile_r = min(_TARGET_ROWS,
                 ((R_rows + row_align - 1) // row_align) * row_align)
    n_tiles = pl.cdiv(R_rows, tile_r)

    # Second parallel grid axis (independent of batch) so v7x's two TensorCores
    # split the work even when B == 1; pick a divisor of n_tiles.
    n_chunks = 1
    for cand in (8, 6, 4, 3, 2):
        if n_tiles % cand == 0:
            n_chunks = cand
            break
    inner = n_tiles // n_chunks

    pred4 = pred.reshape(B, 2, R_rows, _LANES)
    tgt4 = tgt.reshape(B, 2, R_rows, _LANES)

    in_spec = pl.BlockSpec((1, 2, tile_r, _LANES),
                           lambda i, c, k: (i, 0, c * inner + k, 0))
    out_spec = pl.BlockSpec((1, 1, _SUBLANES, _LANES),
                            lambda i, c, k: (i, c, 0, 0))

    kernel = functools.partial(_euclid_rad_kernel,
                               inner=inner, tile_r=tile_r, valid_rows=R_rows)

    partials = pl.pallas_call(
        kernel,
        out_shape=jax.ShapeDtypeStruct((B, n_chunks, _SUBLANES, _LANES),
                                       jnp.float32),
        grid_spec=pltpu.PrefetchScalarGridSpec(
            num_scalar_prefetch=0,
            grid=(B, n_chunks, inner),
            in_specs=[in_spec, in_spec],
            out_specs=out_spec,
            scratch_shapes=[pltpu.VMEM((_SUBLANES, _LANES), jnp.float32)],
        ),
        compiler_params=pltpu.CompilerParams(
            dimension_semantics=("parallel", "parallel", "arbitrary"),
            vmem_limit_bytes=32 * 1024 * 1024),
        cost_estimate=pl.CostEstimate(
            flops=12 * n_elems,
            transcendentals=4 * n_elems,
            bytes_accessed=4 * n_elems * itemsize
                           + B * n_chunks * _SUBLANES * _LANES * 4),
    )(pred4, tgt4)

    return jnp.sum(partials) / jnp.float32(n_elems)


def _reference(radiation_pred, radiation_target):
    # Pure-JAX reference mirroring the PyTorch module (uses complex numbers).
    sep = radiation_pred.shape[1] // 2
    p = radiation_pred.astype(jnp.float32)
    t = radiation_target.astype(jnp.float32)
    pm, pp = p[:, :sep], p[:, sep:]
    tm, tp = t[:, :sep], t[:, sep:]
    pm_lin = 10.0 ** (pm / 10.0)
    tm_lin = 10.0 ** (tm / 10.0)
    pred_euc = pm_lin * jnp.exp(1j * pp.astype(jnp.complex64))
    tgt_euc = tm_lin * jnp.exp(1j * tp.astype(jnp.complex64))
    return jnp.abs(pred_euc - tgt_euc).mean()


if __name__ == "__main__":
    key = jax.random.PRNGKey(0)

    cases = [
        ((2, 4, 16, 32), jnp.float32),    # M = 1024: aligned, zero-copy path
        ((2, 4, 16, 16), jnp.float32),    # M = 512:  aligned, partial row tile
        ((2, 6, 5, 7),   jnp.float32),    # M = 105:  lane-unaligned -> padded tail
        ((2, 4, 16, 32), jnp.bfloat16),   # native bf16 streaming (no wrapper upcast)
    ]
    for idx, (shape, dtype) in enumerate(cases):
        k1, k2 = jax.random.split(jax.random.fold_in(key, idx))
        radiation_pred = (jax.random.normal(k1, shape, jnp.float32) * 3.0).astype(dtype)
        radiation_target = (jax.random.normal(k2, shape, jnp.float32) * 3.0).astype(dtype)

        loss = jax.block_until_ready(
            euclidean_radiation_loss(radiation_pred, radiation_target))
        ref = _reference(radiation_pred, radiation_target)
        assert jnp.allclose(loss, ref, rtol=5e-4, atol=1e-5), (shape, dtype, loss, ref)

    print("KERNEL_OK")
</pallas_src>

<mosaic_0001>
module attributes {stable_mosaic.version = 11 : i64} {
  func.func @_euclid_rad_kernel(%arg0: i32, %arg1: i32, %arg2: i32, %arg3: memref<1x2x8x128xf32, #tpu.memory_space<vmem>>, %arg4: memref<1x2x8x128xf32, #tpu.memory_space<vmem>>, %arg5: memref<1x1x8x128xf32, #tpu.memory_space<vmem>>, %arg6: memref<8x128xf32, #tpu.memory_space<vmem>>) attributes {dimension_semantics = [#tpu.dimension_semantics<parallel>, #tpu.dimension_semantics<parallel>, #tpu.dimension_semantics<arbitrary>], iteration_bounds = array<i64: 2, 1, 1>, scalar_prefetch = 0 : i64, scratch_operands = 1 : i64, tpu.core_type = #tpu.core_type<tc>, window_params = [{transform_indices = @transform_0, window_bounds = array<i64: 1, 2, 8, 128>}, {transform_indices = @transform_1, window_bounds = array<i64: 1, 2, 8, 128>}, {transform_indices = @transform_2, window_bounds = array<i64: 1, 1, 8, 128>}]} {
    %c0_i32 = arith.constant 0 : i32
    %0 = arith.cmpi eq, %arg2, %c0_i32 : i32
    %1 = arith.extui %0 : i1 to i32
    %c0_i32_0 = arith.constant 0 : i32
    %2 = arith.cmpi ne, %1, %c0_i32_0 : i32
    scf.if %2 {
      %cst_31 = arith.constant 0.000000e+00 : f32
      %56 = vector.broadcast %cst_31 : f32 to vector<8x128xf32>
      %c0_32 = arith.constant 0 : index
      %c0_33 = arith.constant 0 : index
      %57 = vector.load %arg6[%c0_32, %c0_33] : memref<8x128xf32, #tpu.memory_space<vmem>>, vector<8x128xf32>
      tpu.vector_store %arg6[%c0_32, %c0_33], %56 {strides = array<i32>} : memref<8x128xf32, #tpu.memory_space<vmem>>, vector<8x128xf32>,
    } else {
    }
    %c0 = arith.constant 0 : index
    %c0_1 = arith.constant 0 : index
    %c0_2 = arith.constant 0 : index
    %c0_3 = arith.constant 0 : index
    %3 = vector.load %arg3[%c0, %c0_1, %c0_2, %c0_3] : memref<1x2x8x128xf32, #tpu.memory_space<vmem>>, vector<1x1x8x128xf32>
    %4 = vector.shape_cast %3 : vector<1x1x8x128xf32> to vector<8x128xf32>
    %c0_4 = arith.constant 0 : index
    %c1 = arith.constant 1 : index
    %c0_5 = arith.constant 0 : index
    %c0_6 = arith.constant 0 : index
    %5 = vector.load %arg3[%c0_4, %c1, %c0_5, %c0_6] : memref<1x2x8x128xf32, #tpu.memory_space<vmem>>, vector<1x1x8x128xf32>
    %6 = vector.shape_cast %5 : vector<1x1x8x128xf32> to vector<8x128xf32>
    %c0_7 = arith.constant 0 : index
    %c0_8 = arith.constant 0 : index
    %c0_9 = arith.constant 0 : index
    %c0_10 = arith.constant 0 : index
    %7 = vector.load %arg4[%c0_7, %c0_8, %c0_9, %c0_10] : memref<1x2x8x128xf32, #tpu.memory_space<vmem>>, vector<1x1x8x128xf32>
    %8 = vector.shape_cast %7 : vector<1x1x8x128xf32> to vector<8x128xf32>
    %c0_11 = arith.constant 0 : index
    %c1_12 = arith.constant 1 : index
    %c0_13 = arith.constant 0 : index
    %c0_14 = arith.constant 0 : index
    %9 = vector.load %arg4[%c0_11, %c1_12, %c0_13, %c0_14] : memref<1x2x8x128xf32, #tpu.memory_space<vmem>>, vector<1x1x8x128xf32>
    %10 = vector.shape_cast %9 : vector<1x1x8x128xf32> to vector<8x128xf32>
    %c1_i32 = arith.constant 1 : i32
    %11 = arith.muli %arg1, %c1_i32 : i32
    %12 = arith.addi %11, %arg2 : i32
    %c8_i32 = arith.constant 8 : i32
    %13 = arith.muli %12, %c8_i32 : i32
    %14 = tpu.iota {dimensions = array<i32: 0>} : vector<8x128xi32>
    %c8_i32_15 = arith.constant 8 : i32
    %15 = arith.subi %c8_i32_15, %13 : i32
    %16 = vector.broadcast %15 : i32 to vector<8x128xi32>
    %17 = arith.cmpi slt, %14, %16 : vector<8x128xi32>
    %cst = arith.constant 0.000000e+00 : f32
    %18 = vector.broadcast %cst : f32 to vector<8x128xf32>
    %19 = arith.select %17, %4, %18 : vector<8x128xi1>, vector<8x128xf32>
    %cst_16 = arith.constant 0.000000e+00 : f32
    %20 = vector.broadcast %cst_16 : f32 to vector<8x128xf32>
    %21 = arith.select %17, %6, %20 : vector<8x128xi1>, vector<8x128xf32>
    %cst_17 = arith.constant 0.000000e+00 : f32
    %22 = vector.broadcast %cst_17 : f32 to vector<8x128xf32>
    %23 = arith.select %17, %8, %22 : vector<8x128xi1>, vector<8x128xf32>
    %cst_18 = arith.constant 0.000000e+00 : f32
    %24 = vector.broadcast %cst_18 : f32 to vector<8x128xf32>
    %25 = arith.select %17, %10, %24 : vector<8x128xi1>, vector<8x128xf32>
    %cst_19 = arith.constant 0.23025851 : f32
    %26 = vector.broadcast %cst_19 : f32 to vector<8x128xf32>
    %27 = arith.mulf %19, %26 : vector<8x128xf32>
    %28 = math.exp %27 : vector<8x128xf32>
    %cst_20 = arith.constant 0.23025851 : f32
    %29 = vector.broadcast %cst_20 : f32 to vector<8x128xf32>
    %30 = arith.mulf %23, %29 : vector<8x128xf32>
    %31 = math.exp %30 : vector<8x128xf32>
    %32 = arith.subf %21, %25 : vector<8x128xf32>
    %cst_21 = arith.constant 5.000000e-01 : f32
    %33 = vector.broadcast %cst_21 : f32 to vector<8x128xf32>
    %34 = arith.mulf %33, %32 : vector<8x128xf32>
    %35 = math.sin %34 : vector<8x128xf32>
    %36 = arith.subf %28, %31 : vector<8x128xf32>
    %37 = arith.subf %28, %31 : vector<8x128xf32>
    %38 = arith.mulf %36, %37 : vector<8x128xf32>
    %39 = arith.mulf %28, %31 : vector<8x128xf32>
    %cst_22 = arith.constant 4.000000e+00 : f32
    %40 = vector.broadcast %cst_22 : f32 to vector<8x128xf32>
    %41 = arith.mulf %40, %39 : vector<8x128xf32>
    %42 = arith.mulf %35, %35 : vector<8x128xf32>
    %43 = arith.mulf %41, %42 : vector<8x128xf32>
    %44 = arith.addf %38, %43 : vector<8x128xf32>
    %cst_23 = arith.constant 0.000000e+00 : f32
    %45 = vector.broadcast %cst_23 : f32 to vector<8x128xf32>
    %46 = arith.maximumf %44, %45 : vector<8x128xf32>
    %47 = math.sqrt %46 : vector<8x128xf32>
    %c0_24 = arith.constant 0 : index
    %c0_25 = arith.constant 0 : index
    %48 = vector.load %arg6[%c0_24, %c0_25] : memref<8x128xf32, #tpu.memory_space<vmem>>, vector<8x128xf32>
    %49 = vector.shape_cast %47 : vector<8x128xf32> to vector<1x8x128xf32>
    %cst_26 = arith.constant dense<0.000000e+00> : vector<8x128xf32>
    %50 = vector.multi_reduction <add>, %49, %cst_26 [0] : vector<1x8x128xf32> to vector<8x128xf32>
    %51 = arith.addf %48, %50 : vector<8x128xf32>
    %c0_27 = arith.constant 0 : index
    %c0_28 = arith.constant 0 : index
    %52 = vector.load %arg6[%c0_27, %c0_28] : memref<8x128xf32, #tpu.memory_space<vmem>>, vector<8x128xf32>
    tpu.vector_store %arg6[%c0_27, %c0_28], %51 {strides = array<i32>} : memref<8x128xf32, #tpu.memory_space<vmem>>, vector<8x128xf32>,
    %c0_i32_29 = arith.constant 0 : i32
    %53 = arith.cmpi eq, %arg2, %c0_i32_29 : i32
    %54 = arith.extui %53 : i1 to i32
    %c0_i32_30 = arith.constant 0 : i32
    %55 = arith.cmpi ne, %54, %c0_i32_30 : i32
    scf.if %55 {
      %c0_31 = arith.constant 0 : index
      %c0_32 = arith.constant 0 : index
      %56 = vector.load %arg6[%c0_31, %c0_32] : memref<8x128xf32, #tpu.memory_space<vmem>>, vector<8x128xf32>
      %c0_33 = arith.constant 0 : index
      %c0_34 = arith.constant 0 : index
      %c0_35 = arith.constant 0 : index
      %c0_36 = arith.constant 0 : index
      %57 = vector.load %arg5[%c0_33, %c0_34, %c0_35, %c0_36] : memref<1x1x8x128xf32, #tpu.memory_space<vmem>>, vector<1x1x8x128xf32>
      %58 = vector.shape_cast %57 : vector<1x1x8x128xf32> to vector<8x128xf32>
      %59 = vector.shape_cast %56 : vector<8x128xf32> to vector<1x1x8x128xf32>
      tpu.vector_store %arg5[%c0_33, %c0_34, %c0_35, %c0_36], %59 {strides = array<i32>} : memref<1x1x8x128xf32, #tpu.memory_space<vmem>>, vector<1x1x8x128xf32>,
    } else {
    }
    return
  }
  func.func @transform_0(%arg0: i32, %arg1: i32, %arg2: i32) -> (i32, i32, i32, i32) {
    %c1_i32 = arith.constant 1 : i32
    %0 = arith.muli %arg1, %c1_i32 : i32
    %1 = arith.addi %0, %arg2 : i32
    %c0_i32 = arith.constant 0 : i32
    %c0_i32_0 = arith.constant 0 : i32
    %c0_i32_1 = arith.constant 0 : i32
    return %arg0, %c0_i32, %1, %c0_i32_0 : i32, i32, i32, i32
  }
  func.func @transform_1(%arg0: i32, %arg1: i32, %arg2: i32) -> (i32, i32, i32, i32) {
    %c1_i32 = arith.constant 1 : i32
    %0 = arith.muli %arg1, %c1_i32 : i32
    %1 = arith.addi %0, %arg2 : i32
    %c0_i32 = arith.constant 0 : i32
    %c0_i32_0 = arith.constant 0 : i32
    %c0_i32_1 = arith.constant 0 : i32
    return %arg0, %c0_i32, %1, %c0_i32_0 : i32, i32, i32, i32
  }
  func.func @transform_2(%arg0: i32, %arg1: i32, %arg2: i32) -> (i32, i32, i32, i32) {
    %c0_i32 = arith.constant 0 : i32
    %c0_i32_0 = arith.constant 0 : i32
    %c0_i32_1 = arith.constant 0 : i32
    return %arg0, %arg1, %c0_i32, %c0_i32_0 : i32, i32, i32, i32
  }
}

</mosaic_0001>

<bundles_post_ra>
// kernel: euclidean_radiation_loss.1
= control target key start
LH: loop header
LB: loop body
LE: loop exit
PB: predicated region body
PF: predicated region fallthrough
CT: control target
= control target key end

     0   :  { %s639_s9 = smov 0   ;;  %s641_s10 = smov 0   ;;  %s733_s0 = inlined_call_operand.vmem [shape: f32[2,2,8,128], index: 0, kind: input, shape index: {}]   ;;  %s734_s1 = inlined_call_operand.vmem [shape: f32[2,2,8,128], index: 1, kind: input, shape index: {}]   ;;  %s735_s2 = inlined_call_operand.vmem [shape: f32[2,1,8,128], index: 2, kind: output, shape index: {}]  }
   0x1   :  { %s643_s11 = smov 0  }
   0x2 LB: > { %s31_s12 = sadd.s32 1, %s611_s10  ;;  %p541_p0 = scmp.ge.s32.totalorder %s615_s11, 1  ;;  %s615_s11 = sphi %s643_s11, %s12_s11   ;;  %s611_s10 = sphi %s641_s10, %s737_s10   ;;  %s607_s9 = sphi %s639_s9, %s736_s9  }
   0x3   : > { %p33_p1 = scmp.ge.s32.totalorder %s31_s12, 2  ;;  %p161_p2 = scmp.lt.s32.totalorder %s615_s11, 3 }
   0x5   : > { %s739_s12 = smov (%p33_p1, %s31_s12), 0  ;;  %p162_p3 = pnand %p541_p0, %p161_p2 }
   0x6   : > { %p199_p4 = scmp.lt.s32.totalorder (!%p162_p3), %s607_s9, 1 }
   0x7   : > { %165 = sbr.rel (%p162_p3) target bundleno = 147 (0x93), region = 28 }
   0xc   : > { %s741_s9 = smov (!%p199_p4, %s607_s9), 1  ;;  %v617_v15 = vmov 683565275   ;;  %v618_v17 = vmov 2475754826  }
   0xd   : > { %s554_s13 = sshll.u32 %s741_s9, 4  ;;  %v619_v19 = vmov 2131351028   ;;  %v620_v21 = vmov 2102212464   ;;  %s546_s20 = sshll.u32 %s741_s9, 3 }
   0xe   : > { %s663_s16 = scalar_lea.vmem %s733_s0, %s554_s13  ;;  %s668_s19 = scalar_lea.vmem %s734_s1, %s554_s13  ;;  %v621_v23 = vmov 920167782   ;;  %v622_v29 = vmov 1326507024  }
   0xf   : > { %v547_v0 = vld [vmem:[%s663_s16 + $0x8] sm:$0xff]  ;;  %s224_s23 = scalar_lea.vmem %s735_s2, %s546_s20 }
  0x10   : > { %v548_v1 = vld [vmem:[%s668_s19 + $0x8] sm:$0xff] }
  0x11   : > { %v253_v2 = vsub.f32 %v547_v0, %v548_v1 }
  0x13   : > { %v672_v3 = vmul.f32 0.5, %v253_v2 }
  0x15   : > { %v258_v4 = vand.u32 2139095040, %v672_v3  ;;  %v255_v6 = vand.u32 2147483647, %v672_v3  ;;  %vm257_vm12 = vcmp.lt.s32.totalorder %v672_v3, 0 }
  0x17   : > { %v259_v5 = vshrl.u32 %v258_v4, 23  ;;  %v262_v9 = vand.u32 8388607, %v255_v6  ;;  %v623_v4 = vmov 0   ;;  %vm256_vm13 = vcmp.le.f32.partialorder %v255_v6, 0.7853982 }
  0x19   : > { %v549_v7 = vadd.s32 4294967169, %v259_v5  ;;  %v263_v12 = vor.u32 8388608, %v262_v9 }
  0x1b   : > { %v265_v8 = vadd.s32 1, %v549_v7  ;;  %v681_v31 = vshll.u32 %v263_v12, 8 }
  0x1d   : > { %vm266_vm0 = vcmp.gt.s32.totalorder %v265_v8, 0  ;;  %v304_v43 = vand.u32 65535, %v681_v31  ;;  %v305_v44 = vshrl.u32 %v681_v31, 16 }
  0x1e   : > { %v267_v10 = vsel %vm266_vm0, %v265_v8, 0 }
  0x1f   : > { %v269_v11 = vand.u32 31, %v267_v10  ;;  %v678_v13 = vshrl.u32 %v267_v10, 5 }
  0x21   : > { %v270_v14 = vsub.s32 32, %v269_v11  ;;  %v272_v16 = vshll.u32 %v617_v15, %v269_v11  ;;  %v275_v18 = vshll.u32 %v618_v17, %v269_v11  ;;  %v278_v20 = vshll.u32 %v619_v19, %v269_v11 }
  0x22   : > { %v281_v22 = vshll.u32 %v620_v21, %v269_v11  ;;  %v284_v24 = vshll.u32 %v621_v23, %v269_v11  ;;  %vm287_vm1 = vcmp.lt.s32.totalorder %v678_v13, 1  ;;  %vm290_vm2 = vcmp.lt.s32.totalorder %v678_v13, 4 }
  0x23   : > { %v273_v25 = vshrl.u32 %v618_v17, %v270_v14  ;;  %v276_v26 = vshrl.u32 %v619_v19, %v270_v14  ;;  %v279_v27 = vshrl.u32 %v620_v21, %v270_v14  ;;  %v282_v28 = vshrl.u32 %v621_v23, %v270_v14 }
  0x24   : > { %v285_v30 = vshrl.u32 %v622_v29, %v270_v14  ;;  %vm289_vm3 = vcmp.lt.s32.totalorder %v678_v13, 3  ;;  %vm288_vm4 = vcmp.lt.s32.totalorder %v678_v13, 2  ;;  %v271_v51 = vshrl.u32 %v617_v15, %v270_v14 }
  0x25   : > { %v274_v32 = vor.u32 %v273_v25, %v272_v16  ;;  %v277_v33 = vor.u32 %v276_v26, %v275_v18  ;;  %v280_v34 = vor.u32 %v279_v27, %v278_v20  ;;  %v283_v35 = vor.u32 %v282_v28, %v281_v22 }
  0x26   : > { %v286_v36 = vor.u32 %v285_v30, %v284_v24 }
  0x27   : > { %v295_v37 = vsel %vm287_vm1, %v274_v32, %v277_v33  ;;  %v299_v38 = vsel %vm287_vm1, %v277_v33, %v280_v34  ;;  %v296_v39 = vsel %vm290_vm2, %v283_v35, 920167782  ;;  %v291_v0 = vsel %vm287_vm1, %v271_v51, %v274_v32  ;;  %v230_v32 = vld [vmem:[%s663_s16] sm:$0xff] }
  0x28   : > { %v300_v40 = vsel %vm290_vm2, %v286_v36, 1326507024  ;;  %v297_v41 = vsel %vm289_vm3, %v280_v34, %v296_v39  ;;  %v292_v2 = vsel %vm290_vm2, %v280_v34, 2102212464  ;;  %vm398_vm1 = vweird.f32 %v672_v3 }
  0x29   : > { %v301_v42 = vsel %vm289_vm3, %v283_v35, %v300_v40  ;;  %v298_v45 = vsel %vm288_vm4, %v295_v37, %v297_v41  ;;  %v293_v15 = vsel %vm289_vm3, %v277_v33, %v292_v2  ;;  %v233_v33 = vld [vmem:[%s668_s19] sm:$0xff]  ;;  %v247_v35 = vmul.f32 0.23025851, %v230_v32 }
  0x2a   : > { %v302_v46 = vsel %vm288_vm4, %v299_v38, %v301_v42  ;;  %v328_v49 = vand.u32 65535, %v298_v45  ;;  %v329_v50 = vshrl.u32 %v298_v45, 16  ;;  %v294_v23 = vsel %vm288_vm4, %v291_v0, %v293_v15 }
  0x2b   : > { %v306_v47 = vand.u32 65535, %v302_v46  ;;  %v307_v48 = vshrl.u32 %v302_v46, 16  ;;  %v348_v27 = vmul.u32 %v681_v31, %v294_v23  ;;  %v250_v37 = vmul.f32 0.23025851, %v233_v33 }
  0x2c   : > { %v330_v55 = vmul.u32 %v328_v49, %v304_v43  ;;  %v331_v56 = vmul.u32 %v329_v50, %v304_v43  ;;  %v332_v57 = vmul.u32 %v328_v49, %v305_v44  ;;  %v333_v61 = vmul.u32 %v329_v50, %v305_v44 }
  0x2d   : > { %v308_v52 = vmul.u32 %v306_v47, %v304_v43  ;;  %v309_v53 = vmul.u32 %v307_v48, %v304_v43  ;;  %v310_v54 = vmul.u32 %v306_v47, %v305_v44  ;;  %v311_v58 = vmul.u32 %v307_v48, %v305_v44 }
  0x2e   : > { %v334_v62 = vshll.u32 %v331_v56, 16  ;;  %v336_v63 = vshll.u32 %v332_v57, 16  ;;  %v335_v12 = vshrl.u32 %v331_v56, 16  ;;  %v337_v19 = vshrl.u32 %v332_v57, 16 }
  0x2f   : > { %v312_v59 = vshll.u32 %v309_v53, 16  ;;  %v314_v60 = vshll.u32 %v310_v54, 16  ;;  %v313_v8 = vshrl.u32 %v309_v53, 16  ;;  %v315_v16 = vshrl.u32 %v310_v54, 16 }
  0x30   : > { %vm338_vm6 = vc.u32 %v330_v55, %v334_v62  ;;  %v340_v7 = vadd.s32 %v334_v62, %v330_v55  ;;  %v248_v39 = vmul.f32 1.442695, %v247_v35  ;;  %v251_v13 = vmul.f32 1.442695, %v250_v37 }
  0x31   : > { %vm316_vm5 = vc.u32 %v308_v52, %v312_v59  ;;  %v318_v1 = vadd.s32 %v312_v59, %v308_v52  ;;  %v339_v10 = vsel %vm338_vm6, 1, %v623_v4 }
  0x32   : > { %v317_v5 = vsel %vm316_vm5, 1, %v623_v4  ;;  %v341_v14 = vadd.s32 %v339_v10, %v333_v61  ;;  %vm342_vm8 = vc.u32 %v340_v7, %v336_v63  ;;  %v344_v22 = vadd.s32 %v340_v7, %v336_v63 }
  0x33   : > { %v319_v9 = vadd.s32 %v317_v5, %v311_v58  ;;  %vm320_vm7 = vc.u32 %v318_v1, %v314_v60  ;;  %v343_v18 = vsel %vm342_vm8, 1, %v623_v4  ;;  %587 = vpow2.f32 %v248_v39 }
  0x34   : > { %v321_v11 = vsel %vm320_vm7, 1, %v623_v4  ;;  %v345_v20 = vadd.s32 %v343_v18, %v341_v14  ;;  %589 = vpow2.f32 %v251_v13 }
  0x35   : > { %v323_v17 = vadd.s32 %v321_v11, %v319_v9 }
  0x36   : > { %v346_v24 = vadd.s32 %v345_v20, %v335_v12 }
  0x37   : > { %v324_v21 = vadd.s32 %v323_v17, %v313_v8 }
  0x38   : > { %v347_v26 = vadd.s32 %v346_v24, %v337_v19 }
  0x39   : > { %v325_v25 = vadd.s32 %v324_v21, %v315_v16  ;;  %v588_v45 = vpop.eup %587 }
  0x3a   : > { %v351_v28 = vadd.s32 1, %v347_v26  ;;  %v590_v47 = vpop.eup %589 }
  0x3b   : > { %vm350_vm9 = vc.u32 %v325_v25, %v344_v22  ;;  %v349_v44 = vadd.s32 %v344_v22, %v325_v25  ;;  %v412_v53 = vmul.f32 %v590_v47, %v588_v45  ;;  %v410_v56 = vsub.f32 %v588_v45, %v590_v47 }
  0x3c   : > { %v352_v29 = vsel %vm350_vm9, %v351_v28, %v347_v26 }
  0x3d   : > { %v353_v30 = vadd.s32 %v352_v29, %v348_v27  ;;  %v413_v26 = vmul.f32 4.0, %v412_v53  ;;  %v411_v28 = vmul.f32 %v410_v56, %v410_v56 }
  0x3f   : > { %v354_v34 = vadd.s32 536870912, %v353_v30 }
  0x41   : > { %v355_v36 = vshrl.u32 %v354_v34, 30 }
  0x43   : > { %v356_v38 = vshll.u32 %v355_v36, 30  ;;  %v379_v61 = vsub.s32 4, %v355_v36 }
  0x45   : > { %v357_v40 = vsub.s32 %v353_v30, %v356_v38  ;;  %v380_v0 = vsel %vm257_vm12, %v379_v61, %v355_v36 }
  0x46   : > { %v382_v4 = vsel %vm256_vm13, 0, %v380_v0 }
  0x47   : > { %vm358_vm10 = vcmp.lt.s32.totalorder %v357_v40, 0  ;;  %v359_v41 = vsub.s32 0, %v357_v40  ;;  %v399_v10 = vadd.s32 3, %v382_v4 }
  0x49   : > { %v360_v42 = vsel %vm358_vm10, %v359_v41, %v357_v40  ;;  %v400_v16 = vand.u32 3, %v399_v10 }
  0x4a   : > { %v361_v31 = vclz %v360_v42 }
  0x4b   : > { %vm405_vm14 = vcmp.eq.s32.totalorder %v400_v16, 2  ;;  %vm402_vm15 = vcmp.eq.s32.totalorder %v400_v16, 0  ;;  %vm401_vm0 = vcmp.lt.s32.totalorder %v400_v16, 2 }
  0x4c   : > { %v550_v43 = vadd.s32 4294967294, %v361_v31 }
  0x4e   : > { %vm551_vm11 = vcmp.lt.s32.totalorder %v550_v43, 0 }
  0x4f   : > { %v364_v46 = vsel %vm551_vm11, 0, %v550_v43 }
  0x50   : > { %v365_v48 = vsub.s32 32, %v364_v46  ;;  %v366_v49 = vshll.u32 %v357_v40, %v364_v46  ;;  %v369_v50 = vsub.s32 4294967266, %v364_v46 }
  0x52   : > { %v367_v51 = vshrl.u32 %v349_v44, %v365_v48  ;;  %v370_v52 = vadd.s32 127, %v369_v50 }
  0x54   : > { %v368_v54 = vor.u32 %v367_v51, %v366_v49  ;;  %v371_v55 = vshll.u32 %v370_v52, 23 }
  0x56   : > { %v372_v57 = vor.u32 4788187, %v371_v55  ;;  %v375_v58 = vcvt.s32.f32 %v368_v54 }
  0x58   : > { %v373_v59 = vand.u32 2147483647, %v372_v57 }
  0x5a   : > { %v376_v60 = vmul.f32 %v375_v58, %v373_v59 }
  0x5c   : > { %v377_v62 = vxor.u32 2147483648, %v376_v60 }
  0x5e   : > { %v378_v63 = vsel %vm257_vm12, %v377_v62, %v376_v60 }
  0x5f   : > { %v381_v1 = vsel %vm256_vm13, %v672_v3, %v378_v63 }
  0x60   : > { %v383_v2 = vmul.f32 %v381_v1, %v381_v1 }
  0x62   : > { %v384_v5 = vmul.f32 -0.001358992, %v383_v2  ;;  %v391_v7 = vmul.f32 -0.00019511016, %v383_v2 }
  0x64   : > { %v385_v8 = vadd.f32 0.041655596, %v384_v5  ;;  %v392_v9 = vadd.f32 0.008332121, %v391_v7 }
  0x66   : > { %v386_v11 = vmul.f32 %v385_v8, %v383_v2  ;;  %v393_v12 = vmul.f32 %v392_v9, %v383_v2 }
  0x68   : > { %v387_v14 = vadd.f32 -0.4999988, %v386_v11  ;;  %v394_v15 = vadd.f32 -0.16666654, %v393_v12 }
  0x6a   : > { %v388_v17 = vmul.f32 %v387_v14, %v383_v2  ;;  %v395_v18 = vmul.f32 %v394_v15, %v383_v2 }
  0x6c   : > { %v389_v6 = vadd.f32 1.0, %v388_v17  ;;  %v396_v19 = vadd.f32 1.0, %v395_v18 }
  0x6e   : > { %v397_v20 = vmul.f32 %v396_v19, %v381_v1  ;;  %v406_v21 = vxor.u32 2147483648, %v389_v6 }
  0x70   : > { %v403_v22 = vxor.u32 2147483648, %v397_v20  ;;  %v407_v23 = vsel %vm405_vm14, %v406_v21, %v397_v20 }
  0x72   : > { %v404_v24 = vsel %vm402_vm15, %v389_v6, %v403_v22 }
  0x73   : > { %v408_v25 = vsel %vm401_vm0, %v404_v24, %v407_v23 }
  0x74   : > { %v409_v27 = vsel %vm398_vm1, nan, %v408_v25 }
  0x75   : > { %v414_v29 = vmul.f32 %v409_v27, %v409_v27 }
  0x77   : > { %v415_v30 = vmul.f32 %v414_v29, %v413_v26 }
  0x79   : > { %v416_v32 = vadd.f32 %v415_v30, %v411_v28 }
  0x7b   : > { %v417_v33 = vmax.f32 %v416_v32, 0.0 }
  0x7d   : > { %591 = vrsqrt.f32 %v417_v33  ;;  %vm425_vm2 = vcmp.eq.f32.partialorder %v417_v33, inf  ;;  %v428_v3 = vand.u32 2147483648, %v417_v33  ;;  %vm427_vm3 = vcmp.eq.f32.partialorder %v417_v33, 0.0 }
  0x83   : > { %v592_v34 = vpop.eup %591 }
  0x84   : > { %v419_v35 = vmul.f32 %v592_v34, %v417_v33 }
  0x86   : > { %v420_v36 = vmul.f32 %v592_v34, %v419_v35 }
  0x88   : > { %v421_v37 = vmul.f32 0.5, %v420_v36 }
  0x8a   : > { %v422_v38 = vsub.f32 1.5, %v421_v37 }
  0x8c   : > { %v423_v39 = vmul.f32 %v592_v34, %v422_v38 }
  0x8e   : > { %v424_v40 = vmul.f32 %v423_v39, %v417_v33 }
  0x90   : > { %v426_v13 = vsel %vm425_vm2, %v417_v33, %v424_v40 }
  0x91   : > { %v429_v41 = vsel %vm427_vm3, %v428_v3, %v426_v13 }
  0x92   : > { %438 = vst [vmem:[%s224_s23] sm:$0xff] %v429_v41 }
  0x93 PF: > { %s12_s11 = sadd.s32 1, %s615_s11   ;;  %s736_s9 = smov %s611_s10 }
  0x94   : > { %p9_p5 = scmp.ge.s32.totalorder %s12_s11, 4   ;;  %s737_s10 = smov %s739_s12 }
  0x96   :  { %11 = sbr.rel (!%p9_p5) target bundleno = 2 (0x2), region = 71 }

</bundles_post_ra>
